<compile_context>
chip_gen: v6e
topology: v6e:2x2x1
jax: 0.10.0
libtpu: 0.0.40
codegen_flags: <defaults>
</compile_context>

<pallas_src>
import functools

import jax
import jax.numpy as jnp
import numpy as np
from jax import lax
from jax.experimental import pallas as pl
from jax.experimental.pallas import tpu as pltpu


def _round_up(x, m):
    return (x + m - 1) // m * m


def _vmem_limit_bytes():
    """Generation-aware VMEM budget (leave headroom for Mosaic scratch)."""
    cap = None
    try:
        cap = getattr(pltpu.get_tpu_info(), "vmem_capacity_bytes", None)
    except Exception:
        cap = None
    if not cap:
        cap = 64 * 1024 * 1024  # conservative (v7x-class) fallback
    return max(32 * 1024 * 1024,
               min(int(cap) - 16 * 1024 * 1024, 112 * 1024 * 1024))


def _arc_infonce_kernel(f1_ref, y_ref, f2t_ref, loss_ref, corr_ref, *,
                        margin, scale, b1, tm, compute_dtype):
    f1 = f1_ref[...].astype(jnp.float32)               # (TM, Dp)
    y = y_ref[...]                                     # (TM, 1) int32

    # Row-normalize the feat1 tile in f32 (rsqrt -> EUP slot), then cast to
    # the MXU compute dtype.  feat2^T was normalized/cast/transposed once in
    # the wrapper, so the resident (Dp, B2) RHS needs no per-step work.
    inv1 = lax.rsqrt(jnp.maximum(jnp.sum(f1 * f1, axis=1, keepdims=True), 1e-16))
    f1h = (f1 * inv1).astype(compute_dtype)            # (TM, Dp)

    # Cosine similarities on the MXU: (TM, Dp) x (Dp, B2) -> (TM, B2), f32 acc.
    logits = jnp.dot(f1h, f2t_ref[...], preferred_element_type=jnp.float32)

    col = lax.broadcasted_iota(jnp.int32, logits.shape, 1)
    is_tgt = col == y                                   # one-hot target mask

    row_max = jnp.max(logits, axis=1, keepdims=True)                       # (TM,1)
    tgt = jnp.sum(jnp.where(is_tgt, logits, 0.0), axis=1, keepdims=True)   # (TM,1)

    # Stable log-sum-exp with shift = scale*row_max (>= every shifted logit
    # since margin >= 0).  The target column is excluded from the slab exp
    # (its argument is forced to -1e30 -> exp == 0) and its margin-adjusted
    # term is re-added per row -> no slab-wide margin pass, no cancellation.
    neg_arg = jnp.where(is_tgt, jnp.float32(-1e30), scale * (logits - row_max))
    sum_others = jnp.sum(jnp.exp(neg_arg), axis=1, keepdims=True)          # (TM,1)
    z_tgt = scale * (tgt - margin)
    sum_exp = sum_others + jnp.exp(z_tgt - scale * row_max)
    loss_row = scale * row_max + jnp.log(sum_exp) - z_tgt                  # (TM,1)

    # argmax(dim=1) == y  <=>  target logit reaches the row max (differs from
    # first-index argmax only on exact float ties).
    corr_row = (tgt >= row_max).astype(jnp.float32)                        # (TM,1)

    # Mask padded feat1 rows and reduce to per-tile partial sums so writeback
    # is a single element per output per grid step (no (TM,1) masked stores).
    row0 = pl.program_id(0) * tm
    valid = (lax.broadcasted_iota(jnp.int32, (tm, 1), 0) + row0) < b1
    valid_f = valid.astype(jnp.float32)
    loss_ref[...] = jnp.sum(loss_row * valid_f, axis=0, keepdims=True).reshape(1, 1, 1)
    corr_ref[...] = jnp.sum(corr_row * valid_f, axis=0, keepdims=True).reshape(1, 1, 1)


@functools.partial(jax.jit,
                   static_argnames=("margin", "scale", "block_rows", "compute_dtype"))
def arc_infonce(feat1, feat2, y=None, *, margin=0.5, scale=64.0,
                block_rows=256, compute_dtype=jnp.bfloat16):
    """Pallas ArcInfoNCE.forward.  Returns (mean loss, accuracy) scalars.

    compute_dtype controls the MXU operand dtype (bf16 default; pass
    jnp.float32 for exact parity with the f32 reference at ~4x MXU cost).
    """
    b1, d = feat1.shape
    b2, d2 = feat2.shape
    assert d == d2
    if y is None:
        assert b1 == b2
        y = jnp.arange(b1, dtype=jnp.int32)

    vmem_limit = _vmem_limit_bytes()
    cbytes = jnp.dtype(compute_dtype).itemsize

    # Lane-align the feature dim; choose the feat1 row tile.
    dp = _round_up(d, 128)
    tm = min(block_rows, _round_up(b1, 8))

    # Shrink the row tile if resident feat2^T plus the (TM, B2) slab would not
    # fit the VMEM budget (matters on v7x-class 64 MiB parts for big B2/Dp).
    def _est(rows):
        return (2 * rows * dp * 4            # double-buffered feat1 tiles (f32)
                + 2 * dp * b2 * cbytes       # resident feat2^T (worst case 2 bufs)
                + 4 * rows * b2 * 4)         # logits slab + epilogue temporaries
    while tm > 64 and _est(tm) > int(0.7 * vmem_limit):
        tm = max(64, _round_up(tm // 2, 8))
    # TODO(synk): for B2*Dp too large even at tm=64, add a flash-style B2 grid
    # axis with running (max, sum-exp, target) scratch instead of a resident RHS.

    # Prefer >= 2 "parallel" row tiles so both v7x TensorCores get work.
    if _round_up(b1, 8) <= tm and b1 > 8:
        tm = _round_up((b1 + 1) // 2, 8)

    b1p = _round_up(b1, tm)
    num_tiles = b1p // tm

    # feat1: f32, pad rows/features only when needed (normalized in-kernel).
    f1p = feat1.astype(jnp.float32)
    if (b1p, dp) != (b1, d):
        f1p = jnp.pad(f1p, ((0, b1p - b1), (0, dp - d)))

    # labels: (B1p, 1) int32.
    yp = y.astype(jnp.int32).reshape(b1, 1)
    if b1p != b1:
        yp = jnp.pad(yp, ((0, b1p - b1), (0, 0)))

    # feat2: normalize in f32, cast to the compute dtype, transpose to
    # (Dp, B2) in one fused XLA pass; the kernel keeps it VMEM-resident.
    f2 = feat2.astype(jnp.float32)
    inv2 = lax.rsqrt(jnp.maximum(jnp.sum(f2 * f2, axis=1, keepdims=True), 1e-16))
    f2t = (f2 * inv2).astype(compute_dtype).T            # (D, B2)
    if dp != d:
        f2t = jnp.pad(f2t, ((0, dp - d), (0, 0)))

    kernel = functools.partial(
        _arc_infonce_kernel, margin=float(margin), scale=float(scale),
        b1=b1, tm=tm, compute_dtype=compute_dtype)

    loss_parts, corr_parts = pl.pallas_call(
        kernel,
        grid=(num_tiles,),
        in_specs=[
            pl.BlockSpec((tm, dp), lambda i: (i, 0)),    # feat1 tile (pipelined)
            pl.BlockSpec((tm, 1), lambda i: (i, 0)),     # label tile
            pl.BlockSpec((dp, b2), lambda i: (0, 0)),    # feat2^T resident (const idx)
        ],
        out_specs=(
            pl.BlockSpec((1, 1, 1), lambda i: (i, 0, 0)),   # per-tile loss sum
            pl.BlockSpec((1, 1, 1), lambda i: (i, 0, 0)),   # per-tile correct sum
        ),
        out_shape=(
            jax.ShapeDtypeStruct((num_tiles, 1, 1), jnp.float32),
            jax.ShapeDtypeStruct((num_tiles, 1, 1), jnp.float32),
        ),
        compiler_params=pltpu.CompilerParams(
            dimension_semantics=("parallel",),           # independent row tiles
            vmem_limit_bytes=vmem_limit,
        ),
        cost_estimate=pl.CostEstimate(
            flops=2 * b1p * b2 * dp + 10 * b1p * b2 + 3 * (b1p + b2) * dp,
            transcendentals=b1p * b2 + 2 * b1p + b2,
            bytes_accessed=4 * b1p * dp + cbytes * dp * b2 + 4 * b1p + 8 * num_tiles,
        ),
    )(f1p, yp, f2t)

    loss = jnp.sum(loss_parts) / b1
    acc = jnp.sum(corr_parts) / b1
    return loss, acc


def _reference(feat1, feat2, y, margin=0.5, scale=64.0):
    # Pure-JAX f32 reference mirroring the PyTorch module.
    n1 = jnp.linalg.norm(feat1, axis=1, keepdims=True)
    n2 = jnp.linalg.norm(feat2, axis=1, keepdims=True)
    logits = (feat1 @ feat2.T) / jnp.maximum(n1 * n2.T, 1e-8)
    acc = jnp.mean((jnp.argmax(logits, axis=1) == y).astype(jnp.float32))
    onehot = jax.nn.one_hot(y, feat2.shape[0], dtype=jnp.float32)
    z = (logits - margin * onehot) * scale
    logp = jax.nn.log_softmax(z, axis=1)
    loss = -jnp.mean(jnp.sum(onehot * logp, axis=1))
    return loss, acc


def _reference_rounded(feat1, feat2, y, margin=0.5, scale=64.0,
                       compute_dtype=jnp.bfloat16):
    # Same math, but with the kernel's normalization + operand rounding, so
    # the bf16 compute path can be checked at tight tolerance.
    f1 = feat1.astype(jnp.float32)
    f2 = feat2.astype(jnp.float32)
    inv1 = lax.rsqrt(jnp.maximum(jnp.sum(f1 * f1, axis=1, keepdims=True), 1e-16))
    inv2 = lax.rsqrt(jnp.maximum(jnp.sum(f2 * f2, axis=1, keepdims=True), 1e-16))
    f1h = (f1 * inv1).astype(compute_dtype)
    f2h = (f2 * inv2).astype(compute_dtype)
    logits = jnp.dot(f1h, f2h.T, preferred_element_type=jnp.float32)
    acc = jnp.mean((jnp.argmax(logits, axis=1) == y).astype(jnp.float32))
    onehot = jax.nn.one_hot(y, feat2.shape[0], dtype=jnp.float32)
    z = (logits - margin * onehot) * scale
    logp = jax.nn.log_softmax(z, axis=1)
    loss = -jnp.mean(jnp.sum(onehot * logp, axis=1))
    return loss, acc


if __name__ == "__main__":
    key = jax.random.PRNGKey(0)
    k1, k2, k3, k4, k5 = jax.random.split(key, 5)

    # Case 1: default labels (y=None -> arange), square batch, f32 compute
    # for exact parity with the reference.
    B, D = 8, 32
    feat1 = jax.random.normal(k1, (B, D), dtype=jnp.float32)
    feat2 = jax.random.normal(k2, (B, D), dtype=jnp.float32)
    loss, acc = arc_infonce(feat1, feat2, compute_dtype=jnp.float32)
    jax.block_until_ready((loss, acc))
    ref_loss, ref_acc = _reference(feat1, feat2, jnp.arange(B, dtype=jnp.int32))
    assert np.allclose(np.asarray(loss), np.asarray(ref_loss), rtol=5e-4, atol=5e-4), (loss, ref_loss)
    assert np.allclose(np.asarray(acc), np.asarray(ref_acc), rtol=1e-5, atol=1e-5), (acc, ref_acc)

    # Case 2: explicit labels, rectangular batch, multi-tile grid with row and
    # feature padding, f32 compute.
    B1b, B2b, Db = 20, 16, 40
    f1b = jax.random.normal(k3, (B1b, Db), dtype=jnp.float32)
    f2b = jax.random.normal(k4, (B2b, Db), dtype=jnp.float32)
    yb = jax.random.randint(k5, (B1b,), 0, B2b, dtype=jnp.int32)
    loss2, acc2 = arc_infonce(f1b, f2b, yb, block_rows=8, compute_dtype=jnp.float32)
    jax.block_until_ready((loss2, acc2))
    ref_loss2, ref_acc2 = _reference(f1b, f2b, yb)
    assert np.allclose(np.asarray(loss2), np.asarray(ref_loss2), rtol=5e-4, atol=5e-4), (loss2, ref_loss2)
    assert np.allclose(np.asarray(acc2), np.asarray(ref_acc2), rtol=1e-5, atol=1e-5), (acc2, ref_acc2)

    # Case 3: default bf16 MXU path (the fast path) — checked tightly against
    # a reference with the same operand rounding, plus a loose sanity check
    # against the exact f32 reference.
    loss3, acc3 = arc_infonce(f1b, f2b, yb)
    jax.block_until_ready((loss3, acc3))
    rl3, ra3 = _reference_rounded(f1b, f2b, yb)
    assert np.allclose(np.asarray(loss3), np.asarray(rl3), rtol=2e-3, atol=2e-3), (loss3, rl3)
    assert np.allclose(np.asarray(acc3), np.asarray(ra3), rtol=1e-5, atol=1e-5), (acc3, ra3)
    assert np.allclose(np.asarray(loss3), np.asarray(ref_loss2), rtol=5e-2, atol=5e-2), (loss3, ref_loss2)

    print("KERNEL_OK")
</pallas_src>

<mosaic_0001>
module attributes {stable_mosaic.version = 11 : i64} {
  func.func @_arc_infonce_kernel(%arg0: i32, %arg1: memref<8x128xf32, #tpu.memory_space<vmem>>, %arg2: memref<8x1xi32, #tpu.memory_space<vmem>>, %arg3: memref<128x8xf32, #tpu.memory_space<vmem>>, %arg4: memref<1x1x1xf32, #tpu.memory_space<vmem>>, %arg5: memref<1x1x1xf32, #tpu.memory_space<vmem>>) attributes {dimension_semantics = [#tpu.dimension_semantics<parallel>], iteration_bounds = array<i64: 1>, scalar_prefetch = 0 : i64, scratch_operands = 0 : i64, tpu.core_type = #tpu.core_type<tc>, window_params = [{transform_indices = @transform_0, window_bounds = array<i64: 8, 128>}, {transform_indices = @transform_1, window_bounds = array<i64: 8, 1>}, {pipeline_mode = #tpu.pipeline_mode<synchronous>, transform_indices = @transform_2, window_bounds = array<i64: 128, 8>}, {transform_indices = @transform_3, window_bounds = array<i64: 1, 1, 1>}, {transform_indices = @transform_4, window_bounds = array<i64: 1, 1, 1>}]} {
    %c0 = arith.constant 0 : index
    %c0_0 = arith.constant 0 : index
    %0 = vector.load %arg1[%c0, %c0_0] : memref<8x128xf32, #tpu.memory_space<vmem>>, vector<8x128xf32>
    %c0_1 = arith.constant 0 : index
    %c0_2 = arith.constant 0 : index
    %1 = vector.load %arg2[%c0_1, %c0_2] : memref<8x1xi32, #tpu.memory_space<vmem>>, vector<8x1xi32>
    %2 = arith.mulf %0, %0 : vector<8x128xf32>
    %cst = arith.constant dense<0.000000e+00> : vector<8xf32>
    %3 = vector.multi_reduction <add>, %2, %cst [1] : vector<8x128xf32> to vector<8xf32>
    %4 = vector.shape_cast %3 : vector<8xf32> to vector<8x1xf32>
    %cst_3 = arith.constant 1.000000e-16 : f32
    %5 = vector.broadcast %cst_3 : f32 to vector<8x1xf32>
    %6 = arith.maximumf %4, %5 : vector<8x1xf32>
    %7 = math.rsqrt %6 : vector<8x1xf32>
    %8 = vector.broadcast %7 : vector<8x1xf32> to vector<8x128xf32>
    %9 = arith.mulf %0, %8 : vector<8x128xf32>
    %c0_4 = arith.constant 0 : index
    %c0_5 = arith.constant 0 : index
    %10 = vector.load %arg3[%c0_4, %c0_5] : memref<128x8xf32, #tpu.memory_space<vmem>>, vector<128x8xf32>
    %cst_6 = arith.constant dense<0.000000e+00> : vector<8x8xf32>
    %11 = tpu.matmul %9, %10, %cst_6 {dimension_numbers = #tpu.dot_dimension_numbers<[1], [0], [0], [1], [0, 0, 1, 1], [], []>} : vector<8x128xf32>, vector<128x8xf32>, vector<8x8xf32> -> vector<8x8xf32>
    %12 = tpu.iota {dimensions = array<i32: 1>} : vector<8x8xi32>
    %13 = vector.broadcast %1 : vector<8x1xi32> to vector<8x8xi32>
    %14 = arith.cmpi eq, %12, %13 : vector<8x8xi32>
    %cst_7 = arith.constant dense<0xFF800000> : vector<8xf32>
    %15 = vector.multi_reduction <maximumf>, %11, %cst_7 [1] : vector<8x8xf32> to vector<8xf32>
    %16 = vector.shape_cast %15 : vector<8xf32> to vector<8x1xf32>
    %cst_8 = arith.constant 0.000000e+00 : f32
    %17 = vector.broadcast %cst_8 : f32 to vector<8x8xf32>
    %18 = arith.select %14, %11, %17 : vector<8x8xi1>, vector<8x8xf32>
    %cst_9 = arith.constant dense<0.000000e+00> : vector<8xf32>
    %19 = vector.multi_reduction <add>, %18, %cst_9 [1] : vector<8x8xf32> to vector<8xf32>
    %20 = vector.shape_cast %19 : vector<8xf32> to vector<8x1xf32>
    %21 = vector.broadcast %16 : vector<8x1xf32> to vector<8x8xf32>
    %22 = arith.subf %11, %21 : vector<8x8xf32>
    %cst_10 = arith.constant 6.400000e+01 : f32
    %23 = vector.broadcast %cst_10 : f32 to vector<8x8xf32>
    %24 = arith.mulf %23, %22 : vector<8x8xf32>
    %cst_11 = arith.constant -1.000000e+30 : f32
    %25 = vector.broadcast %cst_11 : f32 to vector<8x8xf32>
    %26 = arith.select %14, %25, %24 : vector<8x8xi1>, vector<8x8xf32>
    %27 = math.exp %26 : vector<8x8xf32>
    %cst_12 = arith.constant dense<0.000000e+00> : vector<8xf32>
    %28 = vector.multi_reduction <add>, %27, %cst_12 [1] : vector<8x8xf32> to vector<8xf32>
    %29 = vector.shape_cast %28 : vector<8xf32> to vector<8x1xf32>
    %cst_13 = arith.constant 5.000000e-01 : f32
    %30 = vector.broadcast %cst_13 : f32 to vector<8x1xf32>
    %31 = arith.subf %20, %30 : vector<8x1xf32>
    %cst_14 = arith.constant 6.400000e+01 : f32
    %32 = vector.broadcast %cst_14 : f32 to vector<8x1xf32>
    %33 = arith.mulf %32, %31 : vector<8x1xf32>
    %cst_15 = arith.constant 6.400000e+01 : f32
    %34 = vector.broadcast %cst_15 : f32 to vector<8x1xf32>
    %35 = arith.mulf %34, %16 : vector<8x1xf32>
    %36 = arith.subf %33, %35 : vector<8x1xf32>
    %37 = math.exp %36 : vector<8x1xf32>
    %38 = arith.addf %29, %37 : vector<8x1xf32>
    %cst_16 = arith.constant 6.400000e+01 : f32
    %39 = vector.broadcast %cst_16 : f32 to vector<8x1xf32>
    %40 = arith.mulf %39, %16 : vector<8x1xf32>
    %41 = math.log %38 : vector<8x1xf32>
    %42 = arith.addf %40, %41 : vector<8x1xf32>
    %43 = arith.subf %42, %33 : vector<8x1xf32>
    %44 = arith.cmpf oge, %20, %16 : vector<8x1xf32>
    %45 = arith.extui %44 : vector<8x1xi1> to vector<8x1xi32>
    %46 = arith.sitofp %45 : vector<8x1xi32> to vector<8x1xf32>
    %c8_i32 = arith.constant 8 : i32
    %47 = arith.muli %arg0, %c8_i32 : i32
    %48 = tpu.iota {dimensions = array<i32: 0>} : vector<8x1xi32>
    %49 = vector.broadcast %47 : i32 to vector<8x1xi32>
    %50 = arith.addi %48, %49 : vector<8x1xi32>
    %c8_i32_17 = arith.constant 8 : i32
    %51 = vector.broadcast %c8_i32_17 : i32 to vector<8x1xi32>
    %52 = arith.cmpi slt, %50, %51 : vector<8x1xi32>
    %53 = arith.extui %52 : vector<8x1xi1> to vector<8x1xi32>
    %54 = arith.sitofp %53 : vector<8x1xi32> to vector<8x1xf32>
    %55 = arith.mulf %43, %54 : vector<8x1xf32>
    %cst_18 = arith.constant dense<0.000000e+00> : vector<1xf32>
    %56 = vector.multi_reduction <add>, %55, %cst_18 [0] : vector<8x1xf32> to vector<1xf32>
    %57 = vector.shape_cast %56 : vector<1xf32> to vector<1x1xf32>
    %58 = vector.shape_cast %57 : vector<1x1xf32> to vector<1x1x1xf32>
    %c0_19 = arith.constant 0 : index
    %c0_20 = arith.constant 0 : index
    %c0_21 = arith.constant 0 : index
    %59 = vector.load %arg4[%c0_19, %c0_20, %c0_21] : memref<1x1x1xf32, #tpu.memory_space<vmem>>, vector<1x1x1xf32>
    tpu.vector_store %arg4[%c0_19, %c0_20, %c0_21], %58 {strides = array<i32>} : memref<1x1x1xf32, #tpu.memory_space<vmem>>, vector<1x1x1xf32>,
    %60 = arith.mulf %46, %54 : vector<8x1xf32>
    %cst_22 = arith.constant dense<0.000000e+00> : vector<1xf32>
    %61 = vector.multi_reduction <add>, %60, %cst_22 [0] : vector<8x1xf32> to vector<1xf32>
    %62 = vector.shape_cast %61 : vector<1xf32> to vector<1x1xf32>
    %63 = vector.shape_cast %62 : vector<1x1xf32> to vector<1x1x1xf32>
    %c0_23 = arith.constant 0 : index
    %c0_24 = arith.constant 0 : index
    %c0_25 = arith.constant 0 : index
    %64 = vector.load %arg5[%c0_23, %c0_24, %c0_25] : memref<1x1x1xf32, #tpu.memory_space<vmem>>, vector<1x1x1xf32>
    tpu.vector_store %arg5[%c0_23, %c0_24, %c0_25], %63 {strides = array<i32>} : memref<1x1x1xf32, #tpu.memory_space<vmem>>, vector<1x1x1xf32>,
    return
  }
  func.func @transform_0(%arg0: i32) -> (i32, i32) {
    %c0_i32 = arith.constant 0 : i32
    %c0_i32_0 = arith.constant 0 : i32
    return %arg0, %c0_i32 : i32, i32
  }
  func.func @transform_1(%arg0: i32) -> (i32, i32) {
    %c0_i32 = arith.constant 0 : i32
    %c0_i32_0 = arith.constant 0 : i32
    return %arg0, %c0_i32 : i32, i32
  }
  func.func @transform_2(%arg0: i32) -> (i32, i32) {
    %c0_i32 = arith.constant 0 : i32
    %c0_i32_0 = arith.constant 0 : i32
    %c0_i32_1 = arith.constant 0 : i32
    return %c0_i32, %c0_i32_0 : i32, i32
  }
  func.func @transform_3(%arg0: i32) -> (i32, i32, i32) {
    %c0_i32 = arith.constant 0 : i32
    %c0_i32_0 = arith.constant 0 : i32
    %c0_i32_1 = arith.constant 0 : i32
    return %arg0, %c0_i32, %c0_i32_0 : i32, i32, i32
  }
  func.func @transform_4(%arg0: i32) -> (i32, i32, i32) {
    %c0_i32 = arith.constant 0 : i32
    %c0_i32_0 = arith.constant 0 : i32
    %c0_i32_1 = arith.constant 0 : i32
    return %arg0, %c0_i32, %c0_i32_0 : i32, i32, i32
  }
}

</mosaic_0001>

<bundles_post_ra>
// kernel: arc_infonce.1
= control target key start
LH: loop header
LB: loop body
LE: loop exit
PB: predicated region body
PF: predicated region fallthrough
CT: control target
= control target key end

     0   :  { %10 = vsyncpa [#allocation3], 0  ;;  %v314_v3 = vmov 0.0   ;;  %s434_s0 = inlined_call_operand.vmem [shape: f32[8,128], index: 0, kind: input, shape index: {}]   ;;  %s435_s1 = inlined_call_operand.vmem [shape: s32[8,1], index: 1, kind: input, shape index: {}]   ;;  %s436_s2 = inlined_call_operand.vmem [shape: f32[128,8], index: 2, kind: input, shape index: {}]   ;;  %s437_s3 = inlined_call_operand.hbm [shape: f32[1,1,1], index: 3, kind: output, shape index: {0}]   ;;  %s438_s4 = inlined_call_operand.hbm [shape: f32[1,1,1], index: 4, kind: output, shape index: {1}]  }
   0x1   :  { %v347_v0 = vld [vmem:[%s434_s0] sm:$0xff]  ;;  %v41_v1 = vld [vmem:[%s436_s2 + $0x78] sm:$0xff]  ;;  %220 = vmatprep.subr.mxu0 %v314_v3  ;;  %v40_v4 = vld [vmem:[%s436_s2 + $0x70] sm:$0xff] }
   0x2   :  { %v20_v2 = vmul.f32 %v347_v0, %v347_v0  ;;  %221 = vmatpush3.msra.mxu0 %v41_v1 }
   0x3   :  { %11 = vsyncpa [#allocation5], 0  ;;  %222 = vmatprep.subr.mxu0 %v314_v3  ;;  %v39_v5 = vld [vmem:[%s436_s2 + $0x68] sm:$0xff]  ;;  %v38_v6 = vld [vmem:[%s436_s2 + $0x60] sm:$0xff]  ;;  %vm315_vm0 = vmmov 0   ;;  %v316_v20 = vmov 0   ;;  %v112_v25 = vlaneseq }
   0x4   :  { %21 = vadd.xlane.f32.xlu0 %v20_v2  ;;  %223 = vmatpush3.msra.mxu0 %v40_v4  ;;  %v37_v7 = vld [vmem:[%s436_s2 + $0x58] sm:$0xff]  ;;  %v36_v8 = vld [vmem:[%s436_s2 + $0x50] sm:$0xff]  ;;  %v35_v9 = vld [vmem:[%s436_s2 + $0x48] sm:$0xff]  ;;  %vm118_vm2 = vcmask 64512   ;;  %vm163_vm4 = vcmask 0  }
   0x5   :  { %224 = vmatprep.subr.mxu0 %v314_v3  ;;  %v34_v10 = vld [vmem:[%s436_s2 + $0x40] sm:$0xff]  ;;  %v33_v11 = vld [vmem:[%s436_s2 + $0x38] sm:$0xff]  ;;  %252 = vmatprep.mubr.msk.f32.mxu0 %vm315_vm0, %v314_v3  ;;  %v32_v12 = vld [vmem:[%s436_s2 + $0x30] sm:$0xff]  ;;  %v113_v26 = vand.u32 127, %v112_v25 }
   0x6   :  { %225 = vmatpush3.msra.mxu0 %v39_v5  ;;  %v31_v13 = vld [vmem:[%s436_s2 + $0x28] sm:$0xff]  ;;  %v30_v14 = vld [vmem:[%s436_s2 + $0x20] sm:$0xff]  ;;  %v29_v15 = vld [vmem:[%s436_s2 + $0x18] sm:$0xff]  ;;  %260 = vset.pattern.permute.xlu1 %v316_v20 }
   0x7   :  { %226 = vmatprep.subr.mxu0 %v314_v3  ;;  %v28_v16 = vld [vmem:[%s436_s2 + $0x10] sm:$0xff]  ;;  %v27_v17 = vld [vmem:[%s436_s2 + $0x8] sm:$0xff]  ;;  %v26_v18 = vld [vmem:[%s436_s2] sm:$0xff]  ;;  %261 = vset.pattern.permute.xlu0 %v316_v20 }
   0x8   :  { %227 = vmatpush3.msra.mxu0 %v38_v6  ;;  %v19_v19 = vld [vmem:[%s435_s1] sm:$0xff]  ;;  %s317_s1 = smov [#allocation4]  }
   0x9   :  { %228 = vmatprep.subr.mxu0 %v314_v3  ;;  %115 = vperm.xlu1 %260, %v19_v19   ;;  %s189_s2 = sshll.u32 %s317_s1, 4  ;;  %s190_s2 = int_to_ptr.vmem [resolvable:$true] %s189_s2 }
   0xa   :  { %229 = vmatpush3.msra.mxu0 %v37_v7  ;;  %s270_s23 = scalar_lea.vmem %s190_s2, 16  ;;  %s274_s24 = scalar_lea.vmem %s190_s2, 32 }
   0xb   :  { %230 = vmatprep.subr.mxu0 %v314_v3  ;;  %p271_p0 = scmp.ne.s32.totalorder %s190_s2, %s270_s23  ;;  %p275_p1 = scmp.lt.s32.totalorder %s190_s2, %s190_s2 }
   0xc   :  { %231 = vmatpush3.msra.mxu0 %v36_v8  ;;  %p276_p2 = scmp.lt.s32.totalorder %s274_s24, %s270_s23 }
   0xd   :  { %232 = vmatprep.subr.mxu0 %v314_v3 }
   0xe   :  { %233 = vmatpush3.msra.mxu0 %v35_v9  ;;  %p277_p3 = por %p276_p2, %p275_p1 }
   0xf   :  { %234 = vmatprep.subr.mxu0 %v314_v3 }
  0x10   :  { %235 = vmatpush3.msra.mxu0 %v34_v10  ;;  %p278_p4 = pnand %p277_p3, %p271_p0 }
  0x11   :  { %236 = vmatprep.subr.mxu0 %v314_v3 }
  0x12   :  { %237 = vmatpush3.msra.mxu0 %v33_v11 }
  0x13   :  { %238 = vmatprep.subr.mxu0 %v314_v3 }
  0x14   :  { %239 = vmatpush3.msra.mxu0 %v32_v12 }
  0x15   :  { %240 = vmatprep.subr.mxu0 %v314_v3 }
  0x16   :  { %241 = vmatpush3.msra.mxu0 %v31_v13 }
  0x17   :  { %242 = vmatprep.subr.mxu0 %v314_v3 }
  0x18   :  { %243 = vmatpush3.msra.mxu0 %v30_v14 }
  0x19   :  { %244 = vmatprep.subr.mxu0 %v314_v3 }
  0x1a   :  { %245 = vmatpush3.msra.mxu0 %v29_v15 }
  0x1b   :  { %246 = vmatprep.subr.mxu0 %v314_v3 }
  0x1c   :  { %247 = vmatpush3.msra.mxu0 %v28_v16 }
  0x1d   :  { %248 = vmatprep.subr.mxu0 %v314_v3 }
  0x1e   :  { %249 = vmatpush3.msra.mxu0 %v27_v17 }
  0x1f   :  { %250 = vmatprep.subr.mxu0 %v314_v3 }
  0x20   :  { %251 = vmatpush3.msra.mxu0 %v26_v18 }
  0x84   :  { %v116_v27 = vpop.permute.xlu1 %115 }
  0x85   :  { %vm117_vm1 = vcmp.eq.s32.totalorder %v113_v26, %v116_v27 }
  0x8d   :  { %v22_v21 = vpop.xlane.xlu0 %21 }
  0x8e   :  { %v23_v22 = vmax.f32 %v22_v21, 1e-16 }
  0x90   :  { %262 = vrsqrt.f32 %v23_v22 }
  0x9d   :  { %v263_v23 = vpop.eup %262 }
  0x9e   :  { %v25_v24 = vmul.f32 %v263_v23, %v347_v0 }
  0xa0   :  { %253 = vmatmul.mubr.f32.vlgmr.msra.gmra.mxu0 %v25_v24 }
 0x160   :  { %v108_v28 = vpop.f32.mrf.mxu0 }
 0x161   :  { %v119_v29 = vsel %vm118_vm2, %v108_v28, -inf  ;;  %v122_v30 = vsel %vm117_vm1, %v108_v28, 0.0 }
 0x162   :  { %120 = vmax.xlane.f32.xlu0 %v119_v29  ;;  %v254_v31 = vpop.f32.mrf.mxu0  ;;  %v123_v32 = vsel %vm118_vm2, %v122_v30, 0.0 }
 0x163   :  { %124 = vadd.xlane.f32.xlu1 %v123_v32 }
 0x1eb   :  { %v121_v33 = vpop.xlane.xlu0 %120 }
 0x1ec   :  { %v126_v34 = vsub.f32 %v108_v28, %v121_v33  ;;  %v125_v35 = vpop.xlane.xlu1 %124 }
 0x1ed   :  { %vm145_vm3 = vcmp.ge.f32.partialorder %v125_v35, %v121_v33 }
 0x1ee   :  { %v127_v36 = vmul.f32 64.0, %v126_v34  ;;  %v202_v37 = vsel %vm145_vm3, 1.0, %v314_v3 }
 0x1ef   :  { %v166_v38 = vrot.slane %v202_v37, 4 }
 0x1f0   :  { %v128_v39 = vsel %vm117_vm1, -1e+30, %v127_v36 }
 0x1f1   :  { %v129_v40 = vmul.f32 1.442695, %v128_v39  ;;  %v167_v41 = vadd.f32 %v202_v37, %v166_v38 }
 0x1f3   :  { %264 = vpow2.f32 %v129_v40  ;;  %v168_v42 = vrot.slane %v167_v41, 2 }
 0x1f5   :  { %v169_v43 = vadd.f32 %v168_v42, %v167_v41 }
 0x1f7   :  { %v170_v44 = vrot.slane %v169_v43, 1 }
 0x1f9   :  { %v171_v45 = vadd.f32 %v170_v44, %v169_v43 }
 0x1fb   :  { %172 = vst.msk [vmem:[#allocation4] sm:$0x1] %vm163_vm4, %v171_v45 }
 0x200   :  { %v265_v46 = vpop.eup %264 }
 0x201   :  { %v131_v47 = vsel %vm118_vm2, %v265_v46, 0.0 }
 0x202   :  { %132 = vadd.xlane.f32.xlu0 %v131_v47 }
 0x203   :  { %281 = shalt.err (!%p278_p4)
}
 0x204   :  { %192 = dma.vmem_to_hbm [thread:$0]  %s190_s2, 16, %s438_s4, [#allocation5]   ;;  %v201_v48 = vadd.f32 -0.5, %v125_v35  ;;  %v136_v50 = vmul.f32 64.0, %v121_v33 }
 0x205   :  { %s318_s27 = smov [#allocation2]  }
 0x206   :  { %v135_v49 = vmul.f32 64.0, %v201_v48  ;;  %s179_s4 = sshll.u32 %s318_s27, 4  ;;  %s180_s4 = int_to_ptr.vmem [resolvable:$true] %s179_s4 }
 0x207   :  { %s290_s28 = scalar_lea.vmem %s180_s4, 16  ;;  %s294_s29 = scalar_lea.vmem %s180_s4, 32 }
 0x208   :  { %v137_v51 = vsub.f32 %v135_v49, %v136_v50  ;;  %p291_p5 = scmp.ne.s32.totalorder %s180_s4, %s290_s28  ;;  %p295_p6 = scmp.lt.s32.totalorder %s180_s4, %s180_s4 }
 0x209   :  { %p296_p7 = scmp.lt.s32.totalorder %s294_s29, %s290_s28 }
 0x20a   :  { %v138_v52 = vmul.f32 1.442695, %v137_v51 }
 0x20b   :  { %p297_p8 = por %p296_p7, %p295_p6 }
 0x20c   :  { %266 = vpow2.f32 %v138_v52 }
 0x20d   :  { %p298_p9 = pnand %p297_p8, %p291_p5 }
 0x219   :  { %v267_v53 = vpop.eup %266 }
 0x28b   :  { %v133_v54 = vpop.xlane.xlu0 %132 }
 0x28c   :  { %v140_v55 = vadd.f32 %v267_v53, %v133_v54 }
 0x28e   :  { %268 = vlog2.f32 %v140_v55 }
 0x29b   :  { %v269_v56 = vpop.eup %268 }
 0x29c   :  { %v142_v57 = vmul.f32 0.6931472, %v269_v56 }
 0x29e   :  { %v143_v58 = vadd.f32 %v142_v57, %v136_v50 }
 0x2a0   :  { %v144_v59 = vsub.f32 %v143_v58, %v135_v49 }
 0x2a2   :  { %v157_v60 = vrot.slane %v144_v59, 4 }
 0x2a4   :  { %v158_v61 = vadd.f32 %v157_v60, %v144_v59 }
 0x2a6   :  { %v159_v62 = vrot.slane %v158_v61, 2 }
 0x2a8   :  { %v160_v63 = vadd.f32 %v159_v62, %v158_v61 }
 0x2aa   :  { %v161_v0 = vrot.slane %v160_v63, 1 }
 0x2ac   :  { %v162_v1 = vadd.f32 %v161_v0, %v160_v63 }
 0x2ae   :  { %164 = vst.msk [vmem:[#allocation2] sm:$0x1] %vm163_vm4, %v162_v1 }
 0x2af   :  { %301 = shalt.err (!%p298_p9)
}
 0x2b0   :  { %182 = dma.vmem_to_hbm [thread:$0]  %s180_s4, 16, %s437_s3, [#allocation3]  }
 0x2b1   :  { %310 = dma.done.wait [#allocation3], 16  }
 0x2b2   :  { %311 = vsyncadd [#allocation3], 4294967280 }
 0x2b3   :  { %312 = dma.done.wait [#allocation5], 16  }
 0x2b4   :  { %313 = vsyncadd [#allocation5], 4294967280 }
 0x2b5   :  { %199 = vsyncpa [#allocation3], 1 }
 0x2b6   :  { %200 = vsyncpa [#allocation5], 1 }

</bundles_post_ra>
